<compile_context>
chip_gen: v6e
topology: v6e:2x2x1
jax: 0.10.0
libtpu: 0.0.40
codegen_flags: <defaults>
</compile_context>

<pallas_src>
import jax
import jax.numpy as jnp
from jax.experimental import pallas as pl
from jax.experimental.pallas import tpu as pltpu


HIDDEN_FF = 256  # width of linear1/linear2 as in the PyTorch module


def _round_up(x, m):
    return ((x + m - 1) // m) * m


def _residual_value_head_kernel(x_ref, w1_ref, b1_ref, w2_ref, b2_ref,
                                w3_ref, b3_ref, out_ref):
    # In-kernel cast of the activation tile to the MXU compute dtype (the
    # wrapper feeds the raw f32 slab; no standalone cast/pad pass over HBM).
    x = x_ref[...].astype(w1_ref.dtype)

    # linear1 + relu  (MXU matmul, f32 accumulation; biases kept in f32).
    h1 = jnp.dot(x, w1_ref[...], preferred_element_type=jnp.float32)
    h1 = jnp.maximum(h1 + b1_ref[...], 0.0)                       # [TM, 256] f32

    # linear2 + relu + residual add (cast back to the compute dtype for MXU).
    h2 = jnp.dot(h1.astype(w2_ref.dtype), w2_ref[...],
                 preferred_element_type=jnp.float32)
    h2 = jnp.maximum(h2 + b2_ref[...], 0.0)
    h = h2 + h1                                                   # [TM, 256] f32

    # dropout: identity in eval mode.
    # TODO(synk): training-mode dropout would use pltpu.prng_seed +
    # pltpu.stateful_bernoulli(p=0.1) and rescale by 1/(1-p).

    # linear3 (out_features = 1): VPU multiply + XLU lane reduction instead of
    # a 1-column MXU matmul.  b3 is a scalar read from SMEM.
    v = jnp.sum(h * w3_ref[...], axis=-1, keepdims=True)          # [TM, 1]
    out_ref[...] = (v + b3_ref[0, 0]).astype(out_ref.dtype)


def _vmem_capacity_bytes():
    """Physical VMEM per core; conservative 64 MiB fallback (works on v7x)."""
    try:
        info = pltpu.get_tpu_info()
        cap = int(getattr(info, "vmem_capacity_bytes", 0))
        if cap > 0:
            return cap
    except Exception:
        pass
    return 64 << 20


def _vmem_footprint(tm, H, in_isz, w_isz, weight_bufs):
    x_tiles = 2 * tm * H * in_isz                       # double-buffered x tile
    x_cast = tm * H * w_isz                             # in-kernel compute-dtype copy
    weights = weight_bufs * (H * HIDDEN_FF + HIDDEN_FF * HIDDEN_FF) * w_isz
    biases = weight_bufs * 3 * HIDDEN_FF * 4
    temps = 3 * tm * HIDDEN_FF * 4                      # h1 / h2 / residual (f32)
    out_tiles = 2 * tm * 4
    return x_tiles + x_cast + weights + biases + temps + out_tiles


def _select_tile_rows(M, H, in_isz, w_isz, block_rows, vmem_limit_bytes):
    if block_rows is not None:
        tm = max(8, _round_up(int(block_rows), 8))
    else:
        tm = 1024                # mem-bound: large tiles amortize ~0.35us/step
    tm = min(tm, _round_up(M, 8))
    if tm >= 128:                # keep full 128-row MXU passes (matters on v5e)
        tm = (tm // 128) * 128
    budget = 0.8 * vmem_limit_bytes   # leave headroom for compiler scratch
    while tm > 8 and _vmem_footprint(tm, H, in_isz, w_isz, 1) > budget:
        tm = max(8, tm // 2)
        if tm >= 128:
            tm = (tm // 128) * 128
    return tm


def _build_pallas_call(M, H, tm, in_dtype, w_dtype, vmem_limit_bytes,
                       single_buffer_weights):
    grid = (pl.cdiv(M, tm),)

    def wspec(shape):
        if single_buffer_weights:
            # Constant index map -> fetched once; single buffer saves VMEM.
            return pl.BlockSpec(shape, lambda i: (0, 0),
                                pipeline_mode=pl.Buffered(1))
        return pl.BlockSpec(shape, lambda i: (0, 0))

    in_isz = jnp.dtype(in_dtype).itemsize
    w_isz = jnp.dtype(w_dtype).itemsize
    flops = 2 * M * (H * HIDDEN_FF + HIDDEN_FF * HIDDEN_FF + HIDDEN_FF)
    bytes_accessed = (M * H * in_isz                                  # x read
                      + (H * HIDDEN_FF + HIDDEN_FF * HIDDEN_FF) * w_isz
                      + (3 * HIDDEN_FF + 1) * 4                       # b1,b2,w3,b3
                      + M * 4)                                        # output write

    return pl.pallas_call(
        _residual_value_head_kernel,
        out_shape=jax.ShapeDtypeStruct((M, 1), jnp.float32),
        grid_spec=pltpu.PrefetchScalarGridSpec(
            num_scalar_prefetch=0,
            grid=grid,
            in_specs=[
                pl.BlockSpec((tm, H), lambda i: (i, 0)),               # x tile
                wspec((H, HIDDEN_FF)),                                 # w1
                wspec((1, HIDDEN_FF)),                                 # b1
                wspec((HIDDEN_FF, HIDDEN_FF)),                         # w2
                wspec((1, HIDDEN_FF)),                                 # b2
                wspec((1, HIDDEN_FF)),                                 # w3 row
                pl.BlockSpec(memory_space=pltpu.MemorySpace.SMEM),     # b3 scalar
            ],
            out_specs=pl.BlockSpec((tm, 1), lambda i: (i, 0)),
        ),
        compiler_params=pltpu.CompilerParams(
            # TODO(synk): on v7x verify both TensorCores are busy in xprof; if
            # one is idle, switch this axis to pltpu.CORE_PARALLEL.
            dimension_semantics=("parallel",),
            vmem_limit_bytes=vmem_limit_bytes),
        cost_estimate=pl.CostEstimate(flops=flops, transcendentals=0,
                                      bytes_accessed=bytes_accessed),
    )


def residual_value_head(hidden_states, params, *, block_rows=None,
                        compute_dtype=jnp.bfloat16, vmem_limit_bytes=None):
    """hidden_states: [B, S, H] float32. Returns values: [B, S, 1] float32."""
    w1, b1, w2, b2, w3, b3 = (params["w1"], params["b1"], params["w2"],
                              params["b2"], params["w3"], params["b3"])
    B, S, H = hidden_states.shape
    M = B * S

    # Feed the activation slab as-is: no wrapper pad / cast pass over HBM.
    # The ragged row tail is handled by the grid (masked boundary stores);
    # tail-block garbage rows are row-independent and never written back.
    x2d = hidden_states.reshape(M, H)

    # Cast the (small) weights only if needed; callers storing bf16 params
    # skip the per-call convert entirely.
    w1c = w1 if w1.dtype == compute_dtype else w1.astype(compute_dtype)
    w2c = w2 if w2.dtype == compute_dtype else w2.astype(compute_dtype)

    in_isz = jnp.dtype(x2d.dtype).itemsize
    w_isz = jnp.dtype(compute_dtype).itemsize

    if vmem_limit_bytes is None:
        # ~75% of physical VMEM: 96 MiB on v5e/v6e (128 MiB), 48 MiB on v7x (64 MiB).
        vmem_limit_bytes = int(_vmem_capacity_bytes() * 3 // 4)
    tm = _select_tile_rows(M, H, in_isz, w_isz, block_rows, vmem_limit_bytes)

    args = (x2d, w1c, b1, w2c, b2, w3, b3)
    try:
        out = _build_pallas_call(M, H, tm, x2d.dtype, compute_dtype,
                                 vmem_limit_bytes, True)(*args)
    except Exception:
        # Fallback if single-buffered weights (pl.Buffered(1)) is rejected by
        # this jax/Mosaic version: default double buffering (pure VMEM cost).
        out = _build_pallas_call(M, H, tm, x2d.dtype, compute_dtype,
                                 vmem_limit_bytes, False)(*args)

    return out.reshape(B, S, 1)


def init_params(key, hidden_size):
    """Deterministic synthetic parameters matching the nn.Module shapes.
    PyTorch stores Linear weights as [out, in]; we keep W1/W2 as [in, out] and
    W3 as a [1, 256] row (so the final layer is a row-reduction)."""
    k1, k2, k3, k4, k5, k6 = jax.random.split(key, 6)
    s1 = 1.0 / jnp.sqrt(hidden_size)
    s2 = 1.0 / jnp.sqrt(HIDDEN_FF)
    return {
        "w1": jax.random.uniform(k1, (hidden_size, HIDDEN_FF), jnp.float32, -s1, s1),
        "b1": jax.random.uniform(k2, (1, HIDDEN_FF), jnp.float32, -s1, s1),
        "w2": jax.random.uniform(k3, (HIDDEN_FF, HIDDEN_FF), jnp.float32, -s2, s2),
        "b2": jax.random.uniform(k4, (1, HIDDEN_FF), jnp.float32, -s2, s2),
        "w3": jax.random.uniform(k5, (1, HIDDEN_FF), jnp.float32, -s2, s2),
        "b3": jax.random.uniform(k6, (1, 1), jnp.float32, -s2, s2),
    }


if __name__ == "__main__":
    key = jax.random.PRNGKey(0)
    kx, kp = jax.random.split(key)

    B, S, H = 2, 8, 32            # batch=2, seq=8, hidden=32
    hidden_states = jax.random.normal(kx, (B, S, H), jnp.float32)
    params = init_params(kp, H)

    # Pure-JAX f32 reference (eval-mode dropout == identity).
    x2d = hidden_states.reshape(-1, H)
    h1 = jnp.maximum(x2d @ params["w1"] + params["b1"], 0.0)
    h2 = jnp.maximum(h1 @ params["w2"] + params["b2"], 0.0) + h1
    ref = (jnp.sum(h2 * params["w3"], axis=-1, keepdims=True)
           + params["b3"]).reshape(B, S, 1)

    # Exact-semantics f32 path.
    value_f32 = residual_value_head(hidden_states, params,
                                    compute_dtype=jnp.float32)
    jax.block_until_ready(value_f32)
    assert value_f32.shape == (B, S, 1)
    assert jnp.allclose(value_f32, ref, atol=1e-5, rtol=1e-5)

    # Default bf16 fast path (f32 accumulation): looser tolerance.
    value_bf16 = residual_value_head(hidden_states, params)
    jax.block_until_ready(value_bf16)
    assert value_bf16.shape == (B, S, 1)
    assert jnp.allclose(value_bf16, ref, atol=5e-2, rtol=5e-2)

    print("KERNEL_OK")
</pallas_src>

<mosaic_0001>
module attributes {stable_mosaic.version = 11 : i64} {
  func.func @_residual_value_head_kernel(%arg0: i32, %arg1: memref<16x32xf32, #tpu.memory_space<vmem>>, %arg2: memref<32x256xf32, #tpu.memory_space<vmem>>, %arg3: memref<1x256xf32, #tpu.memory_space<vmem>>, %arg4: memref<256x256xf32, #tpu.memory_space<vmem>>, %arg5: memref<1x256xf32, #tpu.memory_space<vmem>>, %arg6: memref<1x256xf32, #tpu.memory_space<vmem>>, %arg7: memref<1x1xf32, #tpu.memory_space<smem>>, %arg8: memref<16x1xf32, #tpu.memory_space<vmem>>) attributes {dimension_semantics = [#tpu.dimension_semantics<parallel>], iteration_bounds = array<i64: 1>, scalar_prefetch = 0 : i64, scratch_operands = 0 : i64, tpu.core_type = #tpu.core_type<tc>, window_params = [{transform_indices = @transform_0, window_bounds = array<i64: 16, 32>}, {pipeline_mode = #tpu.pipeline_mode<synchronous>, transform_indices = @transform_1, window_bounds = array<i64: 32, 256>}, {pipeline_mode = #tpu.pipeline_mode<synchronous>, transform_indices = @transform_2, window_bounds = array<i64: 1, 256>}, {pipeline_mode = #tpu.pipeline_mode<synchronous>, transform_indices = @transform_3, window_bounds = array<i64: 256, 256>}, {pipeline_mode = #tpu.pipeline_mode<synchronous>, transform_indices = @transform_4, window_bounds = array<i64: 1, 256>}, {pipeline_mode = #tpu.pipeline_mode<synchronous>, transform_indices = @transform_5, window_bounds = array<i64: 1, 256>}, {transform_indices = @transform_6, window_bounds = array<i64: 1, 1>}, {transform_indices = @transform_7, window_bounds = array<i64: 16, 1>}]} {
    %c0 = arith.constant 0 : index
    %c0_0 = arith.constant 0 : index
    %0 = vector.load %arg1[%c0, %c0_0] : memref<16x32xf32, #tpu.memory_space<vmem>>, vector<16x32xf32>
    %c0_1 = arith.constant 0 : index
    %c0_2 = arith.constant 0 : index
    %1 = vector.load %arg2[%c0_1, %c0_2] : memref<32x256xf32, #tpu.memory_space<vmem>>, vector<32x256xf32>
    %cst = arith.constant dense<0.000000e+00> : vector<16x256xf32>
    %2 = tpu.matmul %0, %1, %cst {dimension_numbers = #tpu.dot_dimension_numbers<[1], [0], [0], [1], [0, 0, 1, 1], [], []>} : vector<16x32xf32>, vector<32x256xf32>, vector<16x256xf32> -> vector<16x256xf32>
    %c0_3 = arith.constant 0 : index
    %c0_4 = arith.constant 0 : index
    %3 = vector.load %arg3[%c0_3, %c0_4] : memref<1x256xf32, #tpu.memory_space<vmem>>, vector<1x256xf32>
    %4 = vector.broadcast %3 : vector<1x256xf32> to vector<16x256xf32>
    %5 = arith.addf %2, %4 : vector<16x256xf32>
    %cst_5 = arith.constant 0.000000e+00 : f32
    %6 = vector.broadcast %cst_5 : f32 to vector<16x256xf32>
    %7 = arith.maximumf %5, %6 : vector<16x256xf32>
    %c0_6 = arith.constant 0 : index
    %c0_7 = arith.constant 0 : index
    %8 = vector.load %arg4[%c0_6, %c0_7] : memref<256x256xf32, #tpu.memory_space<vmem>>, vector<256x256xf32>
    %cst_8 = arith.constant dense<0.000000e+00> : vector<16x256xf32>
    %9 = tpu.matmul %7, %8, %cst_8 {dimension_numbers = #tpu.dot_dimension_numbers<[1], [0], [0], [1], [0, 0, 1, 1], [], []>} : vector<16x256xf32>, vector<256x256xf32>, vector<16x256xf32> -> vector<16x256xf32>
    %c0_9 = arith.constant 0 : index
    %c0_10 = arith.constant 0 : index
    %10 = vector.load %arg5[%c0_9, %c0_10] : memref<1x256xf32, #tpu.memory_space<vmem>>, vector<1x256xf32>
    %11 = vector.broadcast %10 : vector<1x256xf32> to vector<16x256xf32>
    %12 = arith.addf %9, %11 : vector<16x256xf32>
    %cst_11 = arith.constant 0.000000e+00 : f32
    %13 = vector.broadcast %cst_11 : f32 to vector<16x256xf32>
    %14 = arith.maximumf %12, %13 : vector<16x256xf32>
    %15 = arith.addf %14, %7 : vector<16x256xf32>
    %c0_12 = arith.constant 0 : index
    %c0_13 = arith.constant 0 : index
    %16 = vector.load %arg6[%c0_12, %c0_13] : memref<1x256xf32, #tpu.memory_space<vmem>>, vector<1x256xf32>
    %17 = vector.broadcast %16 : vector<1x256xf32> to vector<16x256xf32>
    %18 = arith.mulf %15, %17 : vector<16x256xf32>
    %cst_14 = arith.constant dense<0.000000e+00> : vector<16xf32>
    %19 = vector.multi_reduction <add>, %18, %cst_14 [1] : vector<16x256xf32> to vector<16xf32>
    %20 = vector.shape_cast %19 : vector<16xf32> to vector<16x1xf32>
    %c0_15 = arith.constant 0 : index
    %c0_16 = arith.constant 0 : index
    %21 = memref.load %arg7[%c0_15, %c0_16] : memref<1x1xf32, #tpu.memory_space<smem>>
    %22 = vector.broadcast %21 : f32 to vector<16x1xf32>
    %23 = arith.addf %20, %22 : vector<16x1xf32>
    %c0_17 = arith.constant 0 : index
    %c0_18 = arith.constant 0 : index
    %24 = vector.load %arg8[%c0_17, %c0_18] : memref<16x1xf32, #tpu.memory_space<vmem>>, vector<16x1xf32>
    tpu.vector_store %arg8[%c0_17, %c0_18], %23 {strides = array<i32>} : memref<16x1xf32, #tpu.memory_space<vmem>>, vector<16x1xf32>,
    return
  }
  func.func @transform_0(%arg0: i32) -> (i32, i32) {
    %c0_i32 = arith.constant 0 : i32
    %c0_i32_0 = arith.constant 0 : i32
    return %arg0, %c0_i32 : i32, i32
  }
  func.func @transform_1(%arg0: i32) -> (i32, i32) {
    %c0_i32 = arith.constant 0 : i32
    %c0_i32_0 = arith.constant 0 : i32
    %c0_i32_1 = arith.constant 0 : i32
    return %c0_i32, %c0_i32_0 : i32, i32
  }
  func.func @transform_2(%arg0: i32) -> (i32, i32) {
    %c0_i32 = arith.constant 0 : i32
    %c0_i32_0 = arith.constant 0 : i32
    %c0_i32_1 = arith.constant 0 : i32
    return %c0_i32, %c0_i32_0 : i32, i32
  }
  func.func @transform_3(%arg0: i32) -> (i32, i32) {
    %c0_i32 = arith.constant 0 : i32
    %c0_i32_0 = arith.constant 0 : i32
    %c0_i32_1 = arith.constant 0 : i32
    return %c0_i32, %c0_i32_0 : i32, i32
  }
  func.func @transform_4(%arg0: i32) -> (i32, i32) {
    %c0_i32 = arith.constant 0 : i32
    %c0_i32_0 = arith.constant 0 : i32
    %c0_i32_1 = arith.constant 0 : i32
    return %c0_i32, %c0_i32_0 : i32, i32
  }
  func.func @transform_5(%arg0: i32) -> (i32, i32) {
    %c0_i32 = arith.constant 0 : i32
    %c0_i32_0 = arith.constant 0 : i32
    %c0_i32_1 = arith.constant 0 : i32
    return %c0_i32, %c0_i32_0 : i32, i32
  }
  func.func @transform_6(%arg0: i32) -> (i32, i32) {
    %c0_i32 = arith.constant 0 : i32
    %c0_i32_0 = arith.constant 0 : i32
    %c0_i32_1 = arith.constant 0 : i32
    return %c0_i32, %c0_i32_0 : i32, i32
  }
  func.func @transform_7(%arg0: i32) -> (i32, i32) {
    %c0_i32 = arith.constant 0 : i32
    %c0_i32_0 = arith.constant 0 : i32
    return %arg0, %c0_i32 : i32, i32
  }
}

module attributes {stable_mosaic.version = 11 : i64} {
  func.func @_residual_value_head_kernel(%arg0: i32, %arg1: memref<16x32xf32, #tpu.memory_space<vmem>>, %arg2: memref<32x256xf32, #tpu.memory_space<vmem>>, %arg3: memref<1x256xf32, #tpu.memory_space<vmem>>, %arg4: memref<256x256xf32, #tpu.memory_space<vmem>>, %arg5: memref<1x256xf32, #tpu.memory_space<vmem>>, %arg6: memref<1x256xf32, #tpu.memory_space<vmem>>, %arg7: memref<1x1xf32, #tpu.memory_space<smem>>, %arg8: memref<16x1xf32, #tpu.memory_space<vmem>>) attributes {dimension_semantics = [#tpu.dimension_semantics<parallel>], iteration_bounds = array<i64: 1>, scalar_prefetch = 0 : i64, scratch_operands = 0 : i64, tpu.core_type = #tpu.core_type<tc>, window_params = [{transform_indices = @transform_0, window_bounds = array<i64: 16, 32>}, {pipeline_mode = #tpu.pipeline_mode<synchronous>, transform_indices = @transform_1, window_bounds = array<i64: 32, 256>}, {pipeline_mode = #tpu.pipeline_mode<synchronous>, transform_indices = @transform_2, window_bounds = array<i64: 1, 256>}, {pipeline_mode = #tpu.pipeline_mode<synchronous>, transform_indices = @transform_3, window_bounds = array<i64: 256, 256>}, {pipeline_mode = #tpu.pipeline_mode<synchronous>, transform_indices = @transform_4, window_bounds = array<i64: 1, 256>}, {pipeline_mode = #tpu.pipeline_mode<synchronous>, transform_indices = @transform_5, window_bounds = array<i64: 1, 256>}, {transform_indices = @transform_6, window_bounds = array<i64: 1, 1>}, {transform_indices = @transform_7, window_bounds = array<i64: 16, 1>}]} {
    %c0 = arith.constant 0 : index
    %c0_0 = arith.constant 0 : index
    %0 = vector.load %arg1[%c0, %c0_0] : memref<16x32xf32, #tpu.memory_space<vmem>>, vector<16x32xf32>
    %c0_1 = arith.constant 0 : index
    %c0_2 = arith.constant 0 : index
    %1 = vector.load %arg2[%c0_1, %c0_2] : memref<32x256xf32, #tpu.memory_space<vmem>>, vector<32x256xf32>
    %cst = arith.constant dense<0.000000e+00> : vector<16x256xf32>
    %2 = tpu.matmul %0, %1, %cst {dimension_numbers = #tpu.dot_dimension_numbers<[1], [0], [0], [1], [0, 0, 1, 1], [], []>} : vector<16x32xf32>, vector<32x256xf32>, vector<16x256xf32> -> vector<16x256xf32>
    %c0_3 = arith.constant 0 : index
    %c0_4 = arith.constant 0 : index
    %3 = vector.load %arg3[%c0_3, %c0_4] : memref<1x256xf32, #tpu.memory_space<vmem>>, vector<1x256xf32>
    %4 = vector.broadcast %3 : vector<1x256xf32> to vector<16x256xf32>
    %5 = arith.addf %2, %4 : vector<16x256xf32>
    %cst_5 = arith.constant 0.000000e+00 : f32
    %6 = vector.broadcast %cst_5 : f32 to vector<16x256xf32>
    %7 = arith.maximumf %5, %6 : vector<16x256xf32>
    %c0_6 = arith.constant 0 : index
    %c0_7 = arith.constant 0 : index
    %8 = vector.load %arg4[%c0_6, %c0_7] : memref<256x256xf32, #tpu.memory_space<vmem>>, vector<256x256xf32>
    %cst_8 = arith.constant dense<0.000000e+00> : vector<16x256xf32>
    %9 = tpu.matmul %7, %8, %cst_8 {dimension_numbers = #tpu.dot_dimension_numbers<[1], [0], [0], [1], [0, 0, 1, 1], [], []>} : vector<16x256xf32>, vector<256x256xf32>, vector<16x256xf32> -> vector<16x256xf32>
    %c0_9 = arith.constant 0 : index
    %c0_10 = arith.constant 0 : index
    %10 = vector.load %arg5[%c0_9, %c0_10] : memref<1x256xf32, #tpu.memory_space<vmem>>, vector<1x256xf32>
    %11 = vector.broadcast %10 : vector<1x256xf32> to vector<16x256xf32>
    %12 = arith.addf %9, %11 : vector<16x256xf32>
    %cst_11 = arith.constant 0.000000e+00 : f32
    %13 = vector.broadcast %cst_11 : f32 to vector<16x256xf32>
    %14 = arith.maximumf %12, %13 : vector<16x256xf32>
    %15 = arith.addf %14, %7 : vector<16x256xf32>
    %c0_12 = arith.constant 0 : index
    %c0_13 = arith.constant 0 : index
    %16 = vector.load %arg6[%c0_12, %c0_13] : memref<1x256xf32, #tpu.memory_space<vmem>>, vector<1x256xf32>
    %17 = vector.broadcast %16 : vector<1x256xf32> to vector<16x256xf32>
    %18 = arith.mulf %15, %17 : vector<16x256xf32>
    %cst_14 = arith.constant dense<0.000000e+00> : vector<16xf32>
    %19 = vector.multi_reduction <add>, %18, %cst_14 [1] : vector<16x256xf32> to vector<16xf32>
    %20 = vector.shape_cast %19 : vector<16xf32> to vector<16x1xf32>
    %c0_15 = arith.constant 0 : index
    %c0_16 = arith.constant 0 : index
    %21 = memref.load %arg7[%c0_15, %c0_16] : memref<1x1xf32, #tpu.memory_space<smem>>
    %22 = vector.broadcast %21 : f32 to vector<16x1xf32>
    %23 = arith.addf %20, %22 : vector<16x1xf32>
    %c0_17 = arith.constant 0 : index
    %c0_18 = arith.constant 0 : index
    %24 = vector.load %arg8[%c0_17, %c0_18] : memref<16x1xf32, #tpu.memory_space<vmem>>, vector<16x1xf32>
    tpu.vector_store %arg8[%c0_17, %c0_18], %23 {strides = array<i32>} : memref<16x1xf32, #tpu.memory_space<vmem>>, vector<16x1xf32>,
    return
  }
  func.func @transform_0(%arg0: i32) -> (i32, i32) {
    %c0_i32 = arith.constant 0 : i32
    %c0_i32_0 = arith.constant 0 : i32
    return %arg0, %c0_i32 : i32, i32
  }
  func.func @transform_1(%arg0: i32) -> (i32, i32) {
    %c0_i32 = arith.constant 0 : i32
    %c0_i32_0 = arith.constant 0 : i32
    %c0_i32_1 = arith.constant 0 : i32
    return %c0_i32, %c0_i32_0 : i32, i32
  }
  func.func @transform_2(%arg0: i32) -> (i32, i32) {
    %c0_i32 = arith.constant 0 : i32
    %c0_i32_0 = arith.constant 0 : i32
    %c0_i32_1 = arith.constant 0 : i32
    return %c0_i32, %c0_i32_0 : i32, i32
  }
  func.func @transform_3(%arg0: i32) -> (i32, i32) {
    %c0_i32 = arith.constant 0 : i32
    %c0_i32_0 = arith.constant 0 : i32
    %c0_i32_1 = arith.constant 0 : i32
    return %c0_i32, %c0_i32_0 : i32, i32
  }
  func.func @transform_4(%arg0: i32) -> (i32, i32) {
    %c0_i32 = arith.constant 0 : i32
    %c0_i32_0 = arith.constant 0 : i32
    %c0_i32_1 = arith.constant 0 : i32
    return %c0_i32, %c0_i32_0 : i32, i32
  }
  func.func @transform_5(%arg0: i32) -> (i32, i32) {
    %c0_i32 = arith.constant 0 : i32
    %c0_i32_0 = arith.constant 0 : i32
    %c0_i32_1 = arith.constant 0 : i32
    return %c0_i32, %c0_i32_0 : i32, i32
  }
  func.func @transform_6(%arg0: i32) -> (i32, i32) {
    %c0_i32 = arith.constant 0 : i32
    %c0_i32_0 = arith.constant 0 : i32
    %c0_i32_1 = arith.constant 0 : i32
    return %c0_i32, %c0_i32_0 : i32, i32
  }
  func.func @transform_7(%arg0: i32) -> (i32, i32) {
    %c0_i32 = arith.constant 0 : i32
    %c0_i32_0 = arith.constant 0 : i32
    return %arg0, %c0_i32 : i32, i32
  }
}

</mosaic_0001>

<bundles_post_ra>
// kernel: tpu_custom_call.1
= control target key start
LH: loop header
LB: loop body
LE: loop exit
PB: predicated region body
PF: predicated region fallthrough
CT: control target
= control target key end

     0   :  { %13 = vsyncpa [#allocation4], 0  ;;  %s525_s0 = inlined_call_operand.hbm [shape: f32[16,32], index: 0, kind: input, shape index: {}]   ;;  %s526_s1 = inlined_call_operand.hbm [shape: f32[32,256], index: 1, kind: input, shape index: {}]   ;;  %s527_s2 = inlined_call_operand.vmem [shape: f32[1,256], index: 2, kind: input, shape index: {}]   ;;  %s528_s3 = inlined_call_operand.hbm [shape: f32[256,256], index: 3, kind: input, shape index: {}]   ;;  %s529_s4 = inlined_call_operand.vmem [shape: f32[1,256], index: 4, kind: input, shape index: {}]   ;;  %s530_s5 = inlined_call_operand.vmem [shape: f32[1,256], index: 5, kind: input, shape index: {}]   ;;  %s531_s6 = inlined_call_operand.<no memory space> [shape: f32[1,1], index: 6, kind: input, shape index: {}]   ;;  %s532_s7 = inlined_call_operand.vmem [shape: f32[16,1], index: 7, kind: output, shape index: {}]  }
   0x1   :  { %14 = vsyncpa [#allocation6], 0  ;;  %s448_s24 = smov [#allocation5]  }
   0x2   :  { %s32_s25 = sshll.u32 %s448_s24, 4  ;;  %s33_s25 = int_to_ptr.vmem [resolvable:$true] %s32_s25 }
   0x3   :  { %s392_s26 = scalar_lea.vmem %s33_s25, 1024  ;;  %p397_p1 = scmp.lt.s32.totalorder %s33_s25, %s33_s25 }
   0x4   :  { %p393_p0 = scmp.ne.s32.totalorder %s33_s25, %s392_s26  ;;  %p398_p2 = scmp.lt.s32.totalorder %s392_s26, %s392_s26 }
   0x6   :  { %p399_p3 = por %p398_p2, %p397_p1 }
   0x8   :  { %p400_p4 = pnand %p399_p3, %p393_p0 }
   0xa   :  { %403 = shalt.err (!%p400_p4)
}
   0xb   :  { %s449_s27 = smov 256   ;;  %s450_s28 = smov 16  }
   0xc   :  { %38 = dma.hbm_to_vmem [thread:$0]  %s526_s1, 1024, %s33_s25, [#allocation6], %s449_s27, %s449_s27, %s450_s28  }
   0xd   :  { %s451_s8 = smov [#allocation3]  }
   0xe   :  { %s20_s9 = sshll.u32 %s451_s8, 4  ;;  %s21_s9 = int_to_ptr.vmem [resolvable:$true] %s20_s9 }
   0xf   :  { %s412_s10 = scalar_lea.vmem %s21_s9, 256  ;;  %p417_p6 = scmp.lt.s32.totalorder %s21_s9, %s21_s9 }
  0x10   :  { %p413_p5 = scmp.ne.s32.totalorder %s21_s9, %s412_s10  ;;  %p418_p7 = scmp.lt.s32.totalorder %s412_s10, %s412_s10 }
  0x12   :  { %p419_p8 = por %p418_p7, %p417_p6 }
  0x14   :  { %p420_p9 = pnand %p419_p8, %p413_p5 }
  0x16   :  { %423 = shalt.err (!%p420_p9)
}
  0x17   :  { %s452_s11 = smov 128   ;;  %s453_s12 = smov 8  }
  0x18   :  { %26 = dma.hbm_to_vmem [thread:$0]  %s525_s0, 256, %s21_s9, [#allocation4], %s452_s11, %s452_s11, %s453_s12  }
  0x19   :  { %s454_s15 = smov [#allocation7]  }
  0x1a   :  { %s46_s16 = sshll.u32 %s454_s15, 4  ;;  %s47_s16 = int_to_ptr.vmem [resolvable:$true] %s46_s16 }
  0x1b   :  { %s432_s1 = scalar_lea.vmem %s47_s16, 8192  ;;  %p437_p11 = scmp.lt.s32.totalorder %s47_s16, %s47_s16 }
  0x1c   :  { %p433_p10 = scmp.ne.s32.totalorder %s47_s16, %s432_s1  ;;  %p438_p12 = scmp.lt.s32.totalorder %s432_s1, %s432_s1 }
  0x1e   :  { %p439_p13 = por %p438_p12, %p437_p11 }
  0x20   :  { %p440_p0 = pnand %p439_p13, %p433_p10 }
  0x22   :  { %443 = shalt.err (!%p440_p0)
}
  0x23   :  { %52 = dma.hbm_to_vmem [thread:$0]  %s528_s3, 8192, %s47_s16, [#allocation6], %s449_s27, %s449_s27, %s450_s28  }
  0x24   :  { %444 = dma.done.wait [#allocation4], 256  }
  0x25   :  { %445 = vsyncadd [#allocation4], 4294967040 }
  0x26   :  { %446 = dma.done.wait [#allocation6], 9216  }
  0x27   :  { %447 = vsyncadd [#allocation6], 4294958080  ;;  %v455_v0 = vmov 0.0   ;;  %v77_v1 = vld [vmem:[#allocation5 + $0x38] sm:$0xff]  ;;  %v76_v2 = vld [vmem:[#allocation5 + $0x30] sm:$0xff]  ;;  %vm90_vm0 = vcmask 261120  }
  0x28   :  { %161 = vmatprep.mubr.f32.mxu0 %v455_v0  ;;  %v75_v3 = vld [vmem:[#allocation5 + $0x28] sm:$0xff]  ;;  %121 = vmatprep.subr.mxu0 %v77_v1  ;;  %v74_v4 = vld [vmem:[#allocation5 + $0x20] sm:$0xff]  ;;  %v73_v5 = vld [vmem:[#allocation5 + $0x18] sm:$0xff]  ;;  %vm365_vm1 = vcmask 7168  }
  0x29   :  { %122 = vmatpush1.msra.mxu0 %v76_v2  ;;  %v72_v6 = vld [vmem:[#allocation5 + $0x10] sm:$0xff]  ;;  %v209_v7 = vld [vmem:[#allocation7 + $0xf8] sm:$0xff]  ;;  %v71_v9 = vld [vmem:[#allocation5 + $0x8] sm:$0xff] }
  0x2a   :  { %123 = vmatprep.subr.mxu0 %v75_v3  ;;  %v208_v8 = vld [vmem:[#allocation7 + $0xf0] sm:$0xff]  ;;  %254 = vmatprep.subr.mxu1 %v209_v7  ;;  %v207_v10 = vld [vmem:[#allocation7 + $0xe8] sm:$0xff]  ;;  %v206_v11 = vld [vmem:[#allocation7 + $0xe0] sm:$0xff] }
  0x2b   :  { %124 = vmatpush1.msra.mxu0 %v74_v4  ;;  %v70_v12 = vld [vmem:[#allocation5] sm:$0xff]  ;;  %255 = vmatpush1.msra.mxu1 %v208_v8  ;;  %v205_v13 = vld [vmem:[#allocation7 + $0xd8] sm:$0xff]  ;;  %v68_v14 = vld [vmem:[#allocation3] sm:$0xff] }
  0x2c   :  { %125 = vmatprep.subr.mxu0 %v73_v5  ;;  %256 = vmatprep.subr.mxu1 %v207_v10  ;;  %v204_v15 = vld [vmem:[#allocation7 + $0xd0] sm:$0xff]  ;;  %v203_v16 = vld [vmem:[#allocation7 + $0xc8] sm:$0xff]  ;;  %v202_v17 = vld [vmem:[#allocation7 + $0xc0] sm:$0xff] }
  0x2d   :  { %126 = vmatpush1.msra.mxu0 %v72_v6  ;;  %257 = vmatpush1.msra.mxu1 %v206_v11  ;;  %v201_v18 = vld [vmem:[#allocation7 + $0xb8] sm:$0xff]  ;;  %v200_v20 = vld [vmem:[#allocation7 + $0xb0] sm:$0xff]  ;;  %v199_v21 = vld [vmem:[#allocation7 + $0xa8] sm:$0xff]  ;;  %v80_v11 = vlaneseq }
  0x2e   :  { %127 = vmatprep.subr.mxu0 %v71_v9  ;;  %258 = vmatprep.subr.mxu1 %v205_v13  ;;  %v69_v19 = vld [vmem:[#allocation3 + $0x8] sm:$0xff]  ;;  %v198_v22 = vld [vmem:[#allocation7 + $0xa0] sm:$0xff]  ;;  %v196_v24 = vld [vmem:[#allocation7 + $0x90] sm:$0xff] }
  0x2f   :  { %128 = vmatpush1.msra.mxu0 %v70_v12  ;;  %259 = vmatpush1.msra.mxu1 %v204_v15  ;;  %v197_v23 = vld [vmem:[#allocation7 + $0x98] sm:$0xff]  ;;  %v195_v25 = vld [vmem:[#allocation7 + $0x88] sm:$0xff]  ;;  %v194_v26 = vld [vmem:[#allocation7 + $0x80] sm:$0xff]  ;;  %v81_v12 = vshrl.u32 %v80_v11, 7 }
  0x30   :  { %374 = vmatmul.mubr.msk.f32.vlgmr.msra.gmra.mxu0 %vm90_vm0, %v68_v14  ;;  %260 = vmatprep.subr.mxu1 %v203_v16  ;;  %v193_v27 = vld [vmem:[#allocation7 + $0x78] sm:$0xff]  ;;  %v192_v28 = vld [vmem:[#allocation7 + $0x70] sm:$0xff]  ;;  %v191_v29 = vld [vmem:[#allocation7 + $0x68] sm:$0xff] }
  0x31   :  { %167 = vmatprep.mubr.f32.mxu0 %v455_v0  ;;  %261 = vmatpush1.msra.mxu1 %v202_v17  ;;  %v190_v30 = vld [vmem:[#allocation7 + $0x60] sm:$0xff]  ;;  %v189_v31 = vld [vmem:[#allocation7 + $0x58] sm:$0xff]  ;;  %v188_v32 = vld [vmem:[#allocation7 + $0x50] sm:$0xff]  ;;  %v82_v13 = vsub.s32 0, %v81_v12  ;;  %v86_v15 = vsub.s32 1, %v81_v12 }
  0x32   :  { %262 = vmatprep.subr.mxu1 %v201_v18  ;;  %v187_v33 = vld [vmem:[#allocation7 + $0x48] sm:$0xff]  ;;  %v186_v34 = vld [vmem:[#allocation7 + $0x40] sm:$0xff]  ;;  %v185_v35 = vld [vmem:[#allocation7 + $0x38] sm:$0xff] }
  0x33   :  { %263 = vmatpush1.msra.mxu1 %v200_v20  ;;  %v184_v36 = vld [vmem:[#allocation7 + $0x30] sm:$0xff]  ;;  %v183_v37 = vld [vmem:[#allocation7 + $0x28] sm:$0xff]  ;;  %v182_v38 = vld [vmem:[#allocation7 + $0x20] sm:$0xff] }
  0x34   :  { %375 = vmatmul.mubr.msk.f32.gmra.mxu0 %vm90_vm0, %v69_v19  ;;  %264 = vmatprep.subr.mxu1 %v199_v21  ;;  %v181_v39 = vld [vmem:[#allocation7 + $0x18] sm:$0xff]  ;;  %v180_v40 = vld [vmem:[#allocation7 + $0x10] sm:$0xff]  ;;  %v179_v41 = vld [vmem:[#allocation7 + $0x8] sm:$0xff] }
  0x35   :  { %265 = vmatpush1.msra.mxu1 %v198_v22  ;;  %v178_v42 = vld [vmem:[#allocation7] sm:$0xff]  ;;  %v241_v43 = vld [vmem:[#allocation7 + $0x1f8] sm:$0xff]  ;;  %v240_v44 = vld [vmem:[#allocation7 + $0x1f0] sm:$0xff] }
  0x36   :  { %266 = vmatprep.subr.mxu1 %v197_v23  ;;  %v239_v45 = vld [vmem:[#allocation7 + $0x1e8] sm:$0xff]  ;;  %v238_v46 = vld [vmem:[#allocation7 + $0x1e0] sm:$0xff]  ;;  %v237_v47 = vld [vmem:[#allocation7 + $0x1d8] sm:$0xff] }
  0x37   :  { %267 = vmatpush1.msra.mxu1 %v196_v24  ;;  %v236_v48 = vld [vmem:[#allocation7 + $0x1d0] sm:$0xff]  ;;  %v235_v49 = vld [vmem:[#allocation7 + $0x1c8] sm:$0xff]  ;;  %v234_v50 = vld [vmem:[#allocation7 + $0x1c0] sm:$0xff] }
  0x38   :  { %268 = vmatprep.subr.mxu1 %v195_v25  ;;  %v233_v51 = vld [vmem:[#allocation7 + $0x1b8] sm:$0xff]  ;;  %v232_v52 = vld [vmem:[#allocation7 + $0x1b0] sm:$0xff]  ;;  %v231_v53 = vld [vmem:[#allocation7 + $0x1a8] sm:$0xff] }
  0x39   :  { %269 = vmatpush1.msra.mxu1 %v194_v26  ;;  %v230_v54 = vld [vmem:[#allocation7 + $0x1a0] sm:$0xff]  ;;  %v229_v55 = vld [vmem:[#allocation7 + $0x198] sm:$0xff]  ;;  %v228_v56 = vld [vmem:[#allocation7 + $0x190] sm:$0xff] }
  0x3a   :  { %270 = vmatprep.subr.mxu1 %v193_v27  ;;  %v227_v57 = vld [vmem:[#allocation7 + $0x188] sm:$0xff]  ;;  %v226_v58 = vld [vmem:[#allocation7 + $0x180] sm:$0xff]  ;;  %v225_v59 = vld [vmem:[#allocation7 + $0x178] sm:$0xff] }
  0x3b   :  { %271 = vmatpush1.msra.mxu1 %v192_v28  ;;  %v224_v60 = vld [vmem:[#allocation7 + $0x170] sm:$0xff]  ;;  %v223_v61 = vld [vmem:[#allocation7 + $0x168] sm:$0xff]  ;;  %v222_v62 = vld [vmem:[#allocation7 + $0x160] sm:$0xff] }
  0x3c   :  { %272 = vmatprep.subr.mxu1 %v191_v29  ;;  %v221_v63 = vld [vmem:[#allocation7 + $0x158] sm:$0xff]  ;;  %v220_v0 = vld [vmem:[#allocation7 + $0x150] sm:$0xff]  ;;  %v219_v1 = vld [vmem:[#allocation7 + $0x148] sm:$0xff] }
  0x3d   :  { %273 = vmatpush1.msra.mxu1 %v190_v30  ;;  %v218_v2 = vld [vmem:[#allocation7 + $0x140] sm:$0xff]  ;;  %v217_v3 = vld [vmem:[#allocation7 + $0x138] sm:$0xff]  ;;  %v216_v4 = vld [vmem:[#allocation7 + $0x130] sm:$0xff] }
  0x3e   :  { %274 = vmatprep.subr.mxu1 %v189_v31  ;;  %v215_v5 = vld [vmem:[#allocation7 + $0x128] sm:$0xff]  ;;  %v214_v6 = vld [vmem:[#allocation7 + $0x120] sm:$0xff]  ;;  %v213_v7 = vld [vmem:[#allocation7 + $0x118] sm:$0xff] }
  0x3f   :  { %275 = vmatpush1.msra.mxu1 %v188_v32  ;;  %v212_v8 = vld [vmem:[#allocation7 + $0x110] sm:$0xff]  ;;  %v211_v9 = vld [vmem:[#allocation7 + $0x108] sm:$0xff]  ;;  %v210_v10 = vld [vmem:[#allocation7 + $0x100] sm:$0xff] }
  0x40   :  { %276 = vmatprep.subr.mxu1 %v187_v33  ;;  %v78_v14 = vld [vmem:[%s527_s2] sm:$0x3] }
  0x41   :  { %277 = vmatpush1.msra.mxu1 %v186_v34  ;;  %v83_v16 = vrot.slane %v78_v14, %v82_v13  ;;  %v87_v17 = vrot.slane %v78_v14, %v86_v15  ;;  %v242_v30 = vld [vmem:[%s529_s4] sm:$0x3] }
  0x42   :  { %278 = vmatprep.subr.mxu1 %v185_v35  ;;  %v247_v31 = vrot.slane %v242_v30, %v82_v13  ;;  %v251_v32 = vrot.slane %v242_v30, %v86_v15  ;;  %v339_v35 = vld [vmem:[%s530_s5] sm:$0x3] }
  0x43   :  { %279 = vmatpush1.msra.mxu1 %v184_v36 }
  0x44   :  { %280 = vmatprep.subr.mxu1 %v183_v37 }
  0x45   :  { %281 = vmatpush1.msra.mxu1 %v182_v38 }
  0x46   :  { %282 = vmatprep.subr.mxu1 %v181_v39 }
  0x47   :  { %283 = vmatpush1.msra.mxu1 %v180_v40  ;;  %v344_v40 = vrot.slane %v339_v35, %v82_v13 }
  0x48   :  { %284 = vmatprep.subr.mxu1 %v179_v41 }
  0x49   :  { %285 = vmatpush1.msra.mxu1 %v178_v42 }
  0x4a   :  { %286 = vmatprep.subr.mxu1 %v241_v43 }
  0x4b   :  { %287 = vmatpush2.msra.mxu1 %v240_v44  ;;  %v348_v44 = vrot.slane %v339_v35, %v86_v15 }
  0x4c   :  { %288 = vmatprep.subr.mxu1 %v239_v45 }
  0x4d   :  { %289 = vmatpush2.msra.mxu1 %v238_v46 }
  0x4e   :  { %290 = vmatprep.subr.mxu1 %v237_v47 }
  0x4f   :  { %291 = vmatpush2.msra.mxu1 %v236_v48 }
  0x50   :  { %292 = vmatprep.subr.mxu1 %v235_v49 }
  0x51   :  { %293 = vmatpush2.msra.mxu1 %v234_v50 }
  0x52   :  { %294 = vmatprep.subr.mxu1 %v233_v51 }
  0x53   :  { %295 = vmatpush2.msra.mxu1 %v232_v52 }
  0x54   :  { %296 = vmatprep.subr.mxu1 %v231_v53 }
  0x55   :  { %297 = vmatpush2.msra.mxu1 %v230_v54 }
  0x56   :  { %298 = vmatprep.subr.mxu1 %v229_v55 }
  0x57   :  { %299 = vmatpush2.msra.mxu1 %v228_v56 }
  0x58   :  { %300 = vmatprep.subr.mxu1 %v227_v57 }
  0x59   :  { %301 = vmatpush2.msra.mxu1 %v226_v58  ;;  %v362_v58 = vstv %s531_s6 }
  0x5a   :  { %302 = vmatprep.subr.mxu1 %v225_v59 }
  0x5b   :  { %303 = vmatpush2.msra.mxu1 %v224_v60 }
  0x5c   :  { %304 = vmatprep.subr.mxu1 %v223_v61 }
  0x5d   :  { %305 = vmatpush2.msra.mxu1 %v222_v62 }
  0x5e   :  { %306 = vmatprep.subr.mxu1 %v221_v63 }
  0x5f   :  { %307 = vmatpush2.msra.mxu1 %v220_v0 }
  0x60   :  { %308 = vmatprep.subr.mxu1 %v219_v1 }
  0x61   :  { %309 = vmatpush2.msra.mxu1 %v218_v2 }
  0x62   :  { %310 = vmatprep.subr.mxu1 %v217_v3 }
  0x63   :  { %311 = vmatpush2.msra.mxu1 %v216_v4 }
  0x64   :  { %312 = vmatprep.subr.mxu1 %v215_v5 }
  0x65   :  { %313 = vmatpush2.msra.mxu1 %v214_v6 }
  0x66   :  { %314 = vmatprep.subr.mxu1 %v213_v7 }
  0x67   :  { %315 = vmatpush2.msra.mxu1 %v212_v8 }
  0x68   :  { %316 = vmatprep.subr.mxu1 %v211_v9 }
  0x69   :  { %317 = vmatpush2.msra.mxu1 %v210_v10 }
  0xf0   :  { %v163_v18 = vpop.f32.mrf.mxu0 }
  0xf1   :  { %v164_v19 = vadd.f32 %v163_v18, %v83_v16 }
  0xf2   :  { %v165_v20 = vpop.f32.mrf.mxu0 }
  0xf3   :  { %v166_v21 = vadd.f32 %v165_v20, %v87_v17  ;;  %v174_v24 = vmax.f32 %v164_v19, 0.0 }
  0xf4   :  { %v169_v22 = vpop.f32.mrf.mxu0 }
  0xf5   :  { %v175_v23 = vmax.f32 %v166_v21, 0.0  ;;  %v170_v25 = vadd.f32 %v169_v22, %v83_v16 }
  0xf6   :  { %v171_v26 = vpop.f32.mrf.mxu0 }
  0xf7   :  { %v172_v27 = vadd.f32 %v171_v26, %v87_v17  ;;  %318 = vmatprep.mubr.f32.mxu1 %v175_v23  ;;  %v176_v29 = vmax.f32 %v170_v25, 0.0 }
  0xf8   :  { %319 = vmatmul.mubr.f32.vlgmr.msra.gmra.mxu1 %v174_v24 }
  0xf9   :  { %v177_v28 = vmax.f32 %v172_v27, 0.0 }
  0xfb   :  { %324 = vmatprep.mubr.f32.mxu1 %v177_v28 }
  0xfc   :  { %325 = vmatmul.mubr.f32.gmra.mxu1 %v176_v29 }
 0x1b8   :  { %v320_v33 = vpop.f32.mrf.mxu1 }
 0x1b9   :  { %v321_v34 = vadd.f32 %v320_v33, %v247_v31 }
 0x1ba   :  { %v322_v36 = vpop.f32.mrf.mxu1 }
 0x1bb   :  { %v331_v37 = vmax.f32 %v321_v34, 0.0  ;;  %v323_v38 = vadd.f32 %v322_v36, %v251_v32 }
 0x1bc   :  { %v326_v39 = vpop.f32.mrf.mxu1 }
 0x1bd   :  { %v335_v41 = vadd.f32 %v331_v37, %v174_v24  ;;  %v332_v42 = vmax.f32 %v323_v38, 0.0  ;;  %v327_v43 = vadd.f32 %v326_v39, %v247_v31 }
 0x1be   :  { %v328_v45 = vpop.f32.mrf.mxu1 }
 0x1bf   :  { %v336_v46 = vadd.f32 %v332_v42, %v175_v23  ;;  %v333_v47 = vmax.f32 %v327_v43, 0.0  ;;  %v329_v48 = vadd.f32 %v328_v45, %v251_v32  ;;  %v351_v51 = vmul.f32 %v344_v40, %v335_v41 }
 0x1c1   :  { %v337_v49 = vadd.f32 %v333_v47, %v176_v29  ;;  %v334_v50 = vmax.f32 %v329_v48, 0.0  ;;  %v352_v52 = vmul.f32 %v348_v44, %v336_v46 }
 0x1c3   :  { %v338_v53 = vadd.f32 %v334_v50, %v177_v28  ;;  %v355_v54 = vadd.f32 %v352_v52, %v351_v51  ;;  %v353_v55 = vmul.f32 %v344_v40, %v337_v49 }
 0x1c5   :  { %356 = vadd.xlane.f32.xlu0 %v355_v54  ;;  %v354_v56 = vmul.f32 %v348_v44, %v338_v53 }
 0x1c7   :  { %v358_v57 = vadd.f32 %v354_v56, %v353_v55 }
 0x1c9   :  { %359 = vadd.xlane.f32.xlu0 %v358_v57 }
 0x24e   :  { %v357_v59 = vpop.xlane.xlu0 %356 }
 0x24f   :  { %v363_v60 = vadd.f32 %v362_v58, %v357_v59 }
 0x251   :  { %366 = vst.msk [vmem:[%s532_s7] sm:$0xff] %vm365_vm1, %v363_v60 }
 0x252   :  { %v360_v61 = vpop.xlane.xlu0 %359 }
 0x253   :  { %v364_v62 = vadd.f32 %v362_v58, %v360_v61 }
 0x255   :  { %367 = vst.msk [vmem:[%s532_s7 + $0x8] sm:$0xff] %vm365_vm1, %v364_v62 }
 0x256   :  { %372 = vsyncpa [#allocation4], 1 }
 0x257   :  { %373 = vsyncpa [#allocation6], 1 }

// kernel: tpu_custom_call.1
= control target key start
LH: loop header
LB: loop body
LE: loop exit
PB: predicated region body
PF: predicated region fallthrough
CT: control target
= control target key end

     0   :  { %13 = vsyncpa [#allocation4], 0  ;;  %s525_s0 = inlined_call_operand.hbm [shape: f32[16,32], index: 0, kind: input, shape index: {}]   ;;  %s526_s1 = inlined_call_operand.hbm [shape: f32[32,256], index: 1, kind: input, shape index: {}]   ;;  %s527_s2 = inlined_call_operand.vmem [shape: f32[1,256], index: 2, kind: input, shape index: {}]   ;;  %s528_s3 = inlined_call_operand.hbm [shape: f32[256,256], index: 3, kind: input, shape index: {}]   ;;  %s529_s4 = inlined_call_operand.vmem [shape: f32[1,256], index: 4, kind: input, shape index: {}]   ;;  %s530_s5 = inlined_call_operand.vmem [shape: f32[1,256], index: 5, kind: input, shape index: {}]   ;;  %s531_s6 = inlined_call_operand.<no memory space> [shape: f32[1,1], index: 6, kind: input, shape index: {}]   ;;  %s532_s7 = inlined_call_operand.vmem [shape: f32[16,1], index: 7, kind: output, shape index: {}]  }
   0x1   :  { %14 = vsyncpa [#allocation6], 0  ;;  %s448_s24 = smov [#allocation5]  }
   0x2   :  { %s32_s25 = sshll.u32 %s448_s24, 4  ;;  %s33_s25 = int_to_ptr.vmem [resolvable:$true] %s32_s25 }
   0x3   :  { %s392_s26 = scalar_lea.vmem %s33_s25, 1024  ;;  %p397_p1 = scmp.lt.s32.totalorder %s33_s25, %s33_s25 }
   0x4   :  { %p393_p0 = scmp.ne.s32.totalorder %s33_s25, %s392_s26  ;;  %p398_p2 = scmp.lt.s32.totalorder %s392_s26, %s392_s26 }
   0x6   :  { %p399_p3 = por %p398_p2, %p397_p1 }
   0x8   :  { %p400_p4 = pnand %p399_p3, %p393_p0 }
   0xa   :  { %403 = shalt.err (!%p400_p4)
}
   0xb   :  { %s449_s27 = smov 256   ;;  %s450_s28 = smov 16  }
   0xc   :  { %38 = dma.hbm_to_vmem [thread:$0]  %s526_s1, 1024, %s33_s25, [#allocation6], %s449_s27, %s449_s27, %s450_s28  }
   0xd   :  { %s451_s8 = smov [#allocation3]  }
   0xe   :  { %s20_s9 = sshll.u32 %s451_s8, 4  ;;  %s21_s9 = int_to_ptr.vmem [resolvable:$true] %s20_s9 }
   0xf   :  { %s412_s10 = scalar_lea.vmem %s21_s9, 256  ;;  %p417_p6 = scmp.lt.s32.totalorder %s21_s9, %s21_s9 }
  0x10   :  { %p413_p5 = scmp.ne.s32.totalorder %s21_s9, %s412_s10  ;;  %p418_p7 = scmp.lt.s32.totalorder %s412_s10, %s412_s10 }
  0x12   :  { %p419_p8 = por %p418_p7, %p417_p6 }
  0x14   :  { %p420_p9 = pnand %p419_p8, %p413_p5 }
  0x16   :  { %423 = shalt.err (!%p420_p9)
}
  0x17   :  { %s452_s11 = smov 128   ;;  %s453_s12 = smov 8  }
  0x18   :  { %26 = dma.hbm_to_vmem [thread:$0]  %s525_s0, 256, %s21_s9, [#allocation4], %s452_s11, %s452_s11, %s453_s12  }
  0x19   :  { %s454_s15 = smov [#allocation7]  }
  0x1a   :  { %s46_s16 = sshll.u32 %s454_s15, 4  ;;  %s47_s16 = int_to_ptr.vmem [resolvable:$true] %s46_s16 }
  0x1b   :  { %s432_s1 = scalar_lea.vmem %s47_s16, 8192  ;;  %p437_p11 = scmp.lt.s32.totalorder %s47_s16, %s47_s16 }
  0x1c   :  { %p433_p10 = scmp.ne.s32.totalorder %s47_s16, %s432_s1  ;;  %p438_p12 = scmp.lt.s32.totalorder %s432_s1, %s432_s1 }
  0x1e   :  { %p439_p13 = por %p438_p12, %p437_p11 }
  0x20   :  { %p440_p0 = pnand %p439_p13, %p433_p10 }
  0x22   :  { %443 = shalt.err (!%p440_p0)
}
  0x23   :  { %52 = dma.hbm_to_vmem [thread:$0]  %s528_s3, 8192, %s47_s16, [#allocation6], %s449_s27, %s449_s27, %s450_s28  }
  0x24   :  { %444 = dma.done.wait [#allocation4], 256  }
  0x25   :  { %445 = vsyncadd [#allocation4], 4294967040 }
  0x26   :  { %446 = dma.done.wait [#allocation6], 9216  }
  0x27   :  { %447 = vsyncadd [#allocation6], 4294958080  ;;  %v455_v0 = vmov 0.0   ;;  %v77_v1 = vld [vmem:[#allocation5 + $0x38] sm:$0xff]  ;;  %v76_v2 = vld [vmem:[#allocation5 + $0x30] sm:$0xff]  ;;  %vm90_vm0 = vcmask 261120  }
  0x28   :  { %161 = vmatprep.mubr.f32.mxu0 %v455_v0  ;;  %v75_v3 = vld [vmem:[#allocation5 + $0x28] sm:$0xff]  ;;  %121 = vmatprep.subr.mxu0 %v77_v1  ;;  %v74_v4 = vld [vmem:[#allocation5 + $0x20] sm:$0xff]  ;;  %v73_v5 = vld [vmem:[#allocation5 + $0x18] sm:$0xff]  ;;  %vm365_vm1 = vcmask 7168  }
  0x29   :  { %122 = vmatpush1.msra.mxu0 %v76_v2  ;;  %v72_v6 = vld [vmem:[#allocation5 + $0x10] sm:$0xff]  ;;  %v209_v7 = vld [vmem:[#allocation7 + $0xf8] sm:$0xff]  ;;  %v71_v9 = vld [vmem:[#allocation5 + $0x8] sm:$0xff] }
  0x2a   :  { %123 = vmatprep.subr.mxu0 %v75_v3  ;;  %v208_v8 = vld [vmem:[#allocation7 + $0xf0] sm:$0xff]  ;;  %254 = vmatprep.subr.mxu1 %v209_v7  ;;  %v207_v10 = vld [vmem:[#allocation7 + $0xe8] sm:$0xff]  ;;  %v206_v11 = vld [vmem:[#allocation7 + $0xe0] sm:$0xff] }
  0x2b   :  { %124 = vmatpush1.msra.mxu0 %v74_v4  ;;  %v70_v12 = vld [vmem:[#allocation5] sm:$0xff]  ;;  %255 = vmatpush1.msra.mxu1 %v208_v8  ;;  %v205_v13 = vld [vmem:[#allocation7 + $0xd8] sm:$0xff]  ;;  %v68_v14 = vld [vmem:[#allocation3] sm:$0xff] }
  0x2c   :  { %125 = vmatprep.subr.mxu0 %v73_v5  ;;  %256 = vmatprep.subr.mxu1 %v207_v10  ;;  %v204_v15 = vld [vmem:[#allocation7 + $0xd0] sm:$0xff]  ;;  %v203_v16 = vld [vmem:[#allocation7 + $0xc8] sm:$0xff]  ;;  %v202_v17 = vld [vmem:[#allocation7 + $0xc0] sm:$0xff] }
  0x2d   :  { %126 = vmatpush1.msra.mxu0 %v72_v6  ;;  %257 = vmatpush1.msra.mxu1 %v206_v11  ;;  %v201_v18 = vld [vmem:[#allocation7 + $0xb8] sm:$0xff]  ;;  %v200_v20 = vld [vmem:[#allocation7 + $0xb0] sm:$0xff]  ;;  %v199_v21 = vld [vmem:[#allocation7 + $0xa8] sm:$0xff]  ;;  %v80_v11 = vlaneseq }
  0x2e   :  { %127 = vmatprep.subr.mxu0 %v71_v9  ;;  %258 = vmatprep.subr.mxu1 %v205_v13  ;;  %v69_v19 = vld [vmem:[#allocation3 + $0x8] sm:$0xff]  ;;  %v198_v22 = vld [vmem:[#allocation7 + $0xa0] sm:$0xff]  ;;  %v196_v24 = vld [vmem:[#allocation7 + $0x90] sm:$0xff] }
  0x2f   :  { %128 = vmatpush1.msra.mxu0 %v70_v12  ;;  %259 = vmatpush1.msra.mxu1 %v204_v15  ;;  %v197_v23 = vld [vmem:[#allocation7 + $0x98] sm:$0xff]  ;;  %v195_v25 = vld [vmem:[#allocation7 + $0x88] sm:$0xff]  ;;  %v194_v26 = vld [vmem:[#allocation7 + $0x80] sm:$0xff]  ;;  %v81_v12 = vshrl.u32 %v80_v11, 7 }
  0x30   :  { %374 = vmatmul.mubr.msk.f32.vlgmr.msra.gmra.mxu0 %vm90_vm0, %v68_v14  ;;  %260 = vmatprep.subr.mxu1 %v203_v16  ;;  %v193_v27 = vld [vmem:[#allocation7 + $0x78] sm:$0xff]  ;;  %v192_v28 = vld [vmem:[#allocation7 + $0x70] sm:$0xff]  ;;  %v191_v29 = vld [vmem:[#allocation7 + $0x68] sm:$0xff] }
  0x31   :  { %167 = vmatprep.mubr.f32.mxu0 %v455_v0  ;;  %261 = vmatpush1.msra.mxu1 %v202_v17  ;;  %v190_v30 = vld [vmem:[#allocation7 + $0x60] sm:$0xff]  ;;  %v189_v31 = vld [vmem:[#allocation7 + $0x58] sm:$0xff]  ;;  %v188_v32 = vld [vmem:[#allocation7 + $0x50] sm:$0xff]  ;;  %v82_v13 = vsub.s32 0, %v81_v12  ;;  %v86_v15 = vsub.s32 1, %v81_v12 }
  0x32   :  { %262 = vmatprep.subr.mxu1 %v201_v18  ;;  %v187_v33 = vld [vmem:[#allocation7 + $0x48] sm:$0xff]  ;;  %v186_v34 = vld [vmem:[#allocation7 + $0x40] sm:$0xff]  ;;  %v185_v35 = vld [vmem:[#allocation7 + $0x38] sm:$0xff] }
  0x33   :  { %263 = vmatpush1.msra.mxu1 %v200_v20  ;;  %v184_v36 = vld [vmem:[#allocation7 + $0x30] sm:$0xff]  ;;  %v183_v37 = vld [vmem:[#allocation7 + $0x28] sm:$0xff]  ;;  %v182_v38 = vld [vmem:[#allocation7 + $0x20] sm:$0xff] }
  0x34   :  { %375 = vmatmul.mubr.msk.f32.gmra.mxu0 %vm90_vm0, %v69_v19  ;;  %264 = vmatprep.subr.mxu1 %v199_v21  ;;  %v181_v39 = vld [vmem:[#allocation7 + $0x18] sm:$0xff]  ;;  %v180_v40 = vld [vmem:[#allocation7 + $0x10] sm:$0xff]  ;;  %v179_v41 = vld [vmem:[#allocation7 + $0x8] sm:$0xff] }
  0x35   :  { %265 = vmatpush1.msra.mxu1 %v198_v22  ;;  %v178_v42 = vld [vmem:[#allocation7] sm:$0xff]  ;;  %v241_v43 = vld [vmem:[#allocation7 + $0x1f8] sm:$0xff]  ;;  %v240_v44 = vld [vmem:[#allocation7 + $0x1f0] sm:$0xff] }
  0x36   :  { %266 = vmatprep.subr.mxu1 %v197_v23  ;;  %v239_v45 = vld [vmem:[#allocation7 + $0x1e8] sm:$0xff]  ;;  %v238_v46 = vld [vmem:[#allocation7 + $0x1e0] sm:$0xff]  ;;  %v237_v47 = vld [vmem:[#allocation7 + $0x1d8] sm:$0xff] }
  0x37   :  { %267 = vmatpush1.msra.mxu1 %v196_v24  ;;  %v236_v48 = vld [vmem:[#allocation7 + $0x1d0] sm:$0xff]  ;;  %v235_v49 = vld [vmem:[#allocation7 + $0x1c8] sm:$0xff]  ;;  %v234_v50 = vld [vmem:[#allocation7 + $0x1c0] sm:$0xff] }
  0x38   :  { %268 = vmatprep.subr.mxu1 %v195_v25  ;;  %v233_v51 = vld [vmem:[#allocation7 + $0x1b8] sm:$0xff]  ;;  %v232_v52 = vld [vmem:[#allocation7 + $0x1b0] sm:$0xff]  ;;  %v231_v53 = vld [vmem:[#allocation7 + $0x1a8] sm:$0xff] }
  0x39   :  { %269 = vmatpush1.msra.mxu1 %v194_v26  ;;  %v230_v54 = vld [vmem:[#allocation7 + $0x1a0] sm:$0xff]  ;;  %v229_v55 = vld [vmem:[#allocation7 + $0x198] sm:$0xff]  ;;  %v228_v56 = vld [vmem:[#allocation7 + $0x190] sm:$0xff] }
  0x3a   :  { %270 = vmatprep.subr.mxu1 %v193_v27  ;;  %v227_v57 = vld [vmem:[#allocation7 + $0x188] sm:$0xff]  ;;  %v226_v58 = vld [vmem:[#allocation7 + $0x180] sm:$0xff]  ;;  %v225_v59 = vld [vmem:[#allocation7 + $0x178] sm:$0xff] }
  0x3b   :  { %271 = vmatpush1.msra.mxu1 %v192_v28  ;;  %v224_v60 = vld [vmem:[#allocation7 + $0x170] sm:$0xff]  ;;  %v223_v61 = vld [vmem:[#allocation7 + $0x168] sm:$0xff]  ;;  %v222_v62 = vld [vmem:[#allocation7 + $0x160] sm:$0xff] }
  0x3c   :  { %272 = vmatprep.subr.mxu1 %v191_v29  ;;  %v221_v63 = vld [vmem:[#allocation7 + $0x158] sm:$0xff]  ;;  %v220_v0 = vld [vmem:[#allocation7 + $0x150] sm:$0xff]  ;;  %v219_v1 = vld [vmem:[#allocation7 + $0x148] sm:$0xff] }
  0x3d   :  { %273 = vmatpush1.msra.mxu1 %v190_v30  ;;  %v218_v2 = vld [vmem:[#allocation7 + $0x140] sm:$0xff]  ;;  %v217_v3 = vld [vmem:[#allocation7 + $0x138] sm:$0xff]  ;;  %v216_v4 = vld [vmem:[#allocation7 + $0x130] sm:$0xff] }
  0x3e   :  { %274 = vmatprep.subr.mxu1 %v189_v31  ;;  %v215_v5 = vld [vmem:[#allocation7 + $0x128] sm:$0xff]  ;;  %v214_v6 = vld [vmem:[#allocation7 + $0x120] sm:$0xff]  ;;  %v213_v7 = vld [vmem:[#allocation7 + $0x118] sm:$0xff] }
  0x3f   :  { %275 = vmatpush1.msra.mxu1 %v188_v32  ;;  %v212_v8 = vld [vmem:[#allocation7 + $0x110] sm:$0xff]  ;;  %v211_v9 = vld [vmem:[#allocation7 + $0x108] sm:$0xff]  ;;  %v210_v10 = vld [vmem:[#allocation7 + $0x100] sm:$0xff] }
  0x40   :  { %276 = vmatprep.subr.mxu1 %v187_v33  ;;  %v78_v14 = vld [vmem:[%s527_s2] sm:$0x3] }
  0x41   :  { %277 = vmatpush1.msra.mxu1 %v186_v34  ;;  %v83_v16 = vrot.slane %v78_v14, %v82_v13  ;;  %v87_v17 = vrot.slane %v78_v14, %v86_v15  ;;  %v242_v30 = vld [vmem:[%s529_s4] sm:$0x3] }
  0x42   :  { %278 = vmatprep.subr.mxu1 %v185_v35  ;;  %v247_v31 = vrot.slane %v242_v30, %v82_v13  ;;  %v251_v32 = vrot.slane %v242_v30, %v86_v15  ;;  %v339_v35 = vld [vmem:[%s530_s5] sm:$0x3] }
  0x43   :  { %279 = vmatpush1.msra.mxu1 %v184_v36 }
  0x44   :  { %280 = vmatprep.subr.mxu1 %v183_v37 }
  0x45   :  { %281 = vmatpush1.msra.mxu1 %v182_v38 }
  0x46   :  { %282 = vmatprep.subr.mxu1 %v181_v39 }
  0x47   :  { %283 = vmatpush1.msra.mxu1 %v180_v40  ;;  %v344_v40 = vrot.slane %v339_v35, %v82_v13 }
  0x48   :  { %284 = vmatprep.subr.mxu1 %v179_v41 }
  0x49   :  { %285 = vmatpush1.msra.mxu1 %v178_v42 }
  0x4a   :  { %286 = vmatprep.subr.mxu1 %v241_v43 }
  0x4b   :  { %287 = vmatpush2.msra.mxu1 %v240_v44  ;;  %v348_v44 = vrot.slane %v339_v35, %v86_v15 }
  0x4c   :  { %288 = vmatprep.subr.mxu1 %v239_v45 }
  0x4d   :  { %289 = vmatpush2.msra.mxu1 %v238_v46 }
  0x4e   :  { %290 = vmatprep.subr.mxu1 %v237_v47 }
  0x4f   :  { %291 = vmatpush2.msra.mxu1 %v236_v48 }
  0x50   :  { %292 = vmatprep.subr.mxu1 %v235_v49 }
  0x51   :  { %293 = vmatpush2.msra.mxu1 %v234_v50 }
  0x52   :  { %294 = vmatprep.subr.mxu1 %v233_v51 }
  0x53   :  { %295 = vmatpush2.msra.mxu1 %v232_v52 }
  0x54   :  { %296 = vmatprep.subr.mxu1 %v231_v53 }
  0x55   :  { %297 = vmatpush2.msra.mxu1 %v230_v54 }
  0x56   :  { %298 = vmatprep.subr.mxu1 %v229_v55 }
  0x57   :  { %299 = vmatpush2.msra.mxu1 %v228_v56 }
  0x58   :  { %300 = vmatprep.subr.mxu1 %v227_v57 }
  0x59   :  { %301 = vmatpush2.msra.mxu1 %v226_v58  ;;  %v362_v58 = vstv %s531_s6 }
  0x5a   :  { %302 = vmatprep.subr.mxu1 %v225_v59 }
  0x5b   :  { %303 = vmatpush2.msra.mxu1 %v224_v60 }
  0x5c   :  { %304 = vmatprep.subr.mxu1 %v223_v61 }
  0x5d   :  { %305 = vmatpush2.msra.mxu1 %v222_v62 }
  0x5e   :  { %306 = vmatprep.subr.mxu1 %v221_v63 }
  0x5f   :  { %307 = vmatpush2.msra.mxu1 %v220_v0 }
  0x60   :  { %308 = vmatprep.subr.mxu1 %v219_v1 }
  0x61   :  { %309 = vmatpush2.msra.mxu1 %v218_v2 }
  0x62   :  { %310 = vmatprep.subr.mxu1 %v217_v3 }
  0x63   :  { %311 = vmatpush2.msra.mxu1 %v216_v4 }
  0x64   :  { %312 = vmatprep.subr.mxu1 %v215_v5 }
  0x65   :  { %313 = vmatpush2.msra.mxu1 %v214_v6 }
  0x66   :  { %314 = vmatprep.subr.mxu1 %v213_v7 }
  0x67   :  { %315 = vmatpush2.msra.mxu1 %v212_v8 }
  0x68   :  { %316 = vmatprep.subr.mxu1 %v211_v9 }
  0x69   :  { %317 = vmatpush2.msra.mxu1 %v210_v10 }
  0xf0   :  { %v163_v18 = vpop.f32.mrf.mxu0 }
  0xf1   :  { %v164_v19 = vadd.f32 %v163_v18, %v83_v16 }
  0xf2   :  { %v165_v20 = vpop.f32.mrf.mxu0 }
  0xf3   :  { %v166_v21 = vadd.f32 %v165_v20, %v87_v17  ;;  %v174_v24 = vmax.f32 %v164_v19, 0.0 }
  0xf4   :  { %v169_v22 = vpop.f32.mrf.mxu0 }
  0xf5   :  { %v175_v23 = vmax.f32 %v166_v21, 0.0  ;;  %v170_v25 = vadd.f32 %v169_v22, %v83_v16 }
  0xf6   :  { %v171_v26 = vpop.f32.mrf.mxu0 }
  0xf7   :  { %v172_v27 = vadd.f32 %v171_v26, %v87_v17  ;;  %318 = vmatprep.mubr.f32.mxu1 %v175_v23  ;;  %v176_v29 = vmax.f32 %v170_v25, 0.0 }
  0xf8   :  { %319 = vmatmul.mubr.f32.vlgmr.msra.gmra.mxu1 %v174_v24 }
  0xf9   :  { %v177_v28 = vmax.f32 %v172_v27, 0.0 }
  0xfb   :  { %324 = vmatprep.mubr.f32.mxu1 %v177_v28 }
  0xfc   :  { %325 = vmatmul.mubr.f32.gmra.mxu1 %v176_v29 }
 0x1b8   :  { %v320_v33 = vpop.f32.mrf.mxu1 }
 0x1b9   :  { %v321_v34 = vadd.f32 %v320_v33, %v247_v31 }
 0x1ba   :  { %v322_v36 = vpop.f32.mrf.mxu1 }
 0x1bb   :  { %v331_v37 = vmax.f32 %v321_v34, 0.0  ;;  %v323_v38 = vadd.f32 %v322_v36, %v251_v32 }
 0x1bc   :  { %v326_v39 = vpop.f32.mrf.mxu1 }
 0x1bd   :  { %v335_v41 = vadd.f32 %v331_v37, %v174_v24  ;;  %v332_v42 = vmax.f32 %v323_v38, 0.0  ;;  %v327_v43 = vadd.f32 %v326_v39, %v247_v31 }
 0x1be   :  { %v328_v45 = vpop.f32.mrf.mxu1 }
 0x1bf   :  { %v336_v46 = vadd.f32 %v332_v42, %v175_v23  ;;  %v333_v47 = vmax.f32 %v327_v43, 0.0  ;;  %v329_v48 = vadd.f32 %v328_v45, %v251_v32  ;;  %v351_v51 = vmul.f32 %v344_v40, %v335_v41 }
 0x1c1   :  { %v337_v49 = vadd.f32 %v333_v47, %v176_v29  ;;  %v334_v50 = vmax.f32 %v329_v48, 0.0  ;;  %v352_v52 = vmul.f32 %v348_v44, %v336_v46 }
 0x1c3   :  { %v338_v53 = vadd.f32 %v334_v50, %v177_v28  ;;  %v355_v54 = vadd.f32 %v352_v52, %v351_v51  ;;  %v353_v55 = vmul.f32 %v344_v40, %v337_v49 }
 0x1c5   :  { %356 = vadd.xlane.f32.xlu0 %v355_v54  ;;  %v354_v56 = vmul.f32 %v348_v44, %v338_v53 }
 0x1c7   :  { %v358_v57 = vadd.f32 %v354_v56, %v353_v55 }
 0x1c9   :  { %359 = vadd.xlane.f32.xlu0 %v358_v57 }
 0x24e   :  { %v357_v59 = vpop.xlane.xlu0 %356 }
 0x24f   :  { %v363_v60 = vadd.f32 %v362_v58, %v357_v59 }
 0x251   :  { %366 = vst.msk [vmem:[%s532_s7] sm:$0xff] %vm365_vm1, %v363_v60 }
 0x252   :  { %v360_v61 = vpop.xlane.xlu0 %359 }
 0x253   :  { %v364_v62 = vadd.f32 %v362_v58, %v360_v61 }
 0x255   :  { %367 = vst.msk [vmem:[%s532_s7 + $0x8] sm:$0xff] %vm365_vm1, %v364_v62 }
 0x256   :  { %372 = vsyncpa [#allocation4], 1 }
 0x257   :  { %373 = vsyncpa [#allocation6], 1 }

</bundles_post_ra>
